<compile_context>
chip_gen: v5e
topology: v5e:2x2
jax: 0.10.0
libtpu: 0.0.40
codegen_flags: <defaults>
</compile_context>

<pallas_src>
import jax
import jax.numpy as jnp
from jax.experimental import pallas as pl
from jax.experimental.pallas import tpu as pltpu


def _round_up(x, m):
    return ((x + m - 1) // m) * m


def _choose_tile_m(M, tm_cap, sub):
    """Pick the M tile: a multiple of `sub`, <= tm_cap.  Prefer an exact
    divisor of M (no padded rows -> no post-kernel copy), otherwise bound the
    padded-row waste to <= 1/8 of the padded extent."""
    tm_cap = max(sub, (tm_cap // sub) * sub)
    M_r = _round_up(M, sub)
    if M_r <= tm_cap:
        return M_r
    if M % sub == 0:
        t = tm_cap
        while t >= max(sub, tm_cap // 4):
            if M % t == 0:
                return t
            t -= sub
    t = tm_cap
    while t > sub:
        Mp = _round_up(M, t)
        if (Mp - M) * 8 <= Mp:          # waste <= 1/8
            return t
        t = max(sub, ((t // 2) // sub) * sub)
    return sub


def _patch_embed_kernel(x_ref, w_ref, b_ref, o_ref):
    # x_ref: (tm, Kp) compute dtype, w_ref: (Kp, tn) compute dtype,
    # b_ref: (1, tn) f32, o_ref: (tm, tn) out dtype.
    # Single MXU GEMM with f32 accumulation and a fused bias add.
    acc = jnp.dot(x_ref[...], w_ref[...], preferred_element_type=jnp.float32)
    o_ref[...] = (acc + b_ref[...]).astype(o_ref.dtype)


def patch_embed_forward(x, weight, bias, *, patch_size, embed_dim, ratio,
                        smallest_ratio=0.25, largest_ratio=1.0,
                        tile_m=None, tile_n=512,
                        compute_dtype=jnp.bfloat16, out_dtype=None):
    """x: (B, C, H, W) NCHW.  weight: (embed_dim, C, P, P).  bias: (embed_dim,).
    Returns (B, num_patches, embed_dim_channels) in out_dtype (default x.dtype)."""
    B, C, H, W = x.shape
    P = patch_size
    assert H % P == 0 and W % P == 0, "H, W must be divisible by patch size"
    gh, gw = H // P, W // P
    num_patches = gh * gw

    # Ratio slicing, identical to the PyTorch module.
    embed_dim_channels = int(ratio * embed_dim)
    if ratio == smallest_ratio or ratio == largest_ratio:
        w_sl = weight[:embed_dim_channels]
        b_sl = bias[:embed_dim_channels]
    else:
        w_sl = weight[-embed_dim_channels:]
        b_sl = bias[-embed_dim_channels:]

    K = C * P * P
    M = B * num_patches
    N = embed_dim_channels
    out_dtype = x.dtype if out_dtype is None else out_dtype

    cbytes = jnp.dtype(compute_dtype).itemsize
    obytes = jnp.dtype(out_dtype).itemsize
    sub = {1: 32, 2: 16}.get(cbytes, 8)          # sublane pack of compute dtype

    # Lane-dense padded GEMM sizes (unmasked vst on the output stream).
    Kp = _round_up(K, 128)
    Np = _round_up(N, 128)

    # ---- generation-aware per-core VMEM budget ----
    try:
        vmem_cap = int(pltpu.get_tpu_info().vmem_capacity_bytes)
    except Exception:
        vmem_cap = 64 << 20                       # v7x-safe fallback
    # Tile budget: leave fixed headroom for Mosaic internal scratch/semaphores;
    # never hand the full physical VMEM to the tiling.
    budget = max(16 << 20, min(vmem_cap - (16 << 20), 96 << 20))

    def footprint(tm_, tn_):
        # double-buffered X tile + W tile + bias (sublane padded) + out tile
        return (2 * tm_ * Kp * cbytes + 2 * Kp * tn_ * cbytes
                + 2 * 8 * tn_ * 4 + 2 * tm_ * tn_ * obytes)

    # ---- N tiling: keep W fully VMEM-resident whenever it fits ----
    if footprint(sub, Np) <= budget:
        tn = Np                                   # whole weight resident: one DMA total
    else:
        # Fallback for unrealistically large K*N: 256-wide MXU-aligned N tiles;
        # the N-outer grid below keeps W fetched once per N tile.
        tn = 256
        while tn * 2 <= max(tile_n, 256) and footprint(sub, tn * 2) <= budget:
            tn *= 2
        Np = _round_up(N, tn)

    # ---- M tile from the remaining budget ----
    fixed = 2 * Kp * tn * cbytes + 2 * 8 * tn * 4
    per_row = 2 * Kp * cbytes + 2 * tn * obytes
    tm_cap = max(sub, (budget - fixed) // per_row)
    tm_cap = min(tm_cap, 1024 if tile_m is None else max(tile_m, sub))
    M_r = _round_up(M, sub)
    if M_r >= 2 * sub:
        # keep >= 2 M tiles so both v7x TensorCores get work
        tm_cap = min(tm_cap, _round_up((M_r + 1) // 2, sub))
    tm = _choose_tile_m(M, tm_cap, sub)
    Mp = _round_up(M, tm)

    # ---- build GEMM operands (cast to compute dtype BEFORE the relayout) ----
    # TODO(synk): fuse this unfold into the kernel to drop the wrapper-side
    # HBM relayout of X entirely.
    xc = x.astype(compute_dtype)
    xp = xc.reshape(B, C, gh, P, gw, P)
    xp = jnp.transpose(xp, (0, 2, 4, 1, 3, 5)).reshape(M, K)   # (c, ph, pw) inner order
    if Mp > M or Kp > K:
        xp = jnp.pad(xp, ((0, Mp - M), (0, Kp - K)))           # zero pad -> numeric no-op

    # Conv weight (N, C, P, P) -> (K, N), same (c, kh, kw) ordering, zero padded.
    w_mat = w_sl.reshape(N, K).T.astype(compute_dtype)
    if Kp > K or Np > N:
        w_mat = jnp.pad(w_mat, ((0, Kp - K), (0, Np - N)))
    b_mat = b_sl.astype(jnp.float32).reshape(1, N)
    if Np > N:
        b_mat = jnp.pad(b_mat, ((0, 0), (0, Np - N)))

    # Grid: N tiles OUTER, M tiles INNER -> W's block index is constant across
    # the inner loop, so Pallas elides its re-DMA (each W tile fetched once).
    # In the resident case Np // tn == 1 and only X streams.
    grid = (Np // tn, Mp // tm)

    foot = footprint(tm, tn)
    vmem_limit = int(min(vmem_cap - (8 << 20), max(foot + (8 << 20), 16 << 20)))

    out = pl.pallas_call(
        _patch_embed_kernel,
        out_shape=jax.ShapeDtypeStruct((Mp, Np), out_dtype),
        grid_spec=pltpu.PrefetchScalarGridSpec(
            num_scalar_prefetch=0,
            grid=grid,
            in_specs=[
                pl.BlockSpec((tm, Kp), lambda j, i: (i, 0)),
                pl.BlockSpec((Kp, tn), lambda j, i: (0, j)),
                pl.BlockSpec((1, tn), lambda j, i: (0, j)),
            ],
            out_specs=pl.BlockSpec((tm, tn), lambda j, i: (i, j)),
        ),
        compiler_params=pltpu.CompilerParams(
            dimension_semantics=("parallel", "parallel"),
            vmem_limit_bytes=vmem_limit),
    )(xp, w_mat, b_mat)

    # Slice off M/N padding (metadata-only when tm | M and N % 128 == 0, the
    # common case) and restore (B, num_patches, N).
    return out[:M, :N].reshape(B, num_patches, N)


if __name__ == "__main__":
    # Small, module-consistent shapes:
    #   img_size=16, patch_size=4, in_chans=4, embed_dim=32, batch=2
    B, C, H, W = 2, 4, 16, 16
    P = 4
    embed_dim = 32

    key = jax.random.PRNGKey(0)
    kx, kw, kb = jax.random.split(key, 3)
    x = jax.random.normal(kx, (B, C, H, W), dtype=jnp.float32)
    # Conv2d weight layout (out_chans, in_chans, kH, kW), bias (out_chans,)
    weight = jax.random.normal(kw, (embed_dim, C, P, P), dtype=jnp.float32) * 0.02
    bias = jax.random.normal(kb, (embed_dim,), dtype=jnp.float32) * 0.02

    def reference(ratio):
        edc = int(ratio * embed_dim)
        if ratio == 0.25 or ratio == 1.0:
            w_sl, b_sl = weight[:edc], bias[:edc]
        else:
            w_sl, b_sl = weight[-edc:], bias[-edc:]
        r = jax.lax.conv_general_dilated(
            x, w_sl, window_strides=(P, P), padding="VALID",
            dimension_numbers=("NCHW", "OIHW", "NCHW"))
        r = r + b_sl.reshape(1, edc, 1, 1)
        return r.reshape(B, edc, -1).transpose(0, 2, 1)  # flatten(2).transpose(1,2)

    # ratio=0.5 exercises the "last channels" slicing branch.
    ratio = 0.5
    edc = int(ratio * embed_dim)
    ref = reference(ratio)

    # Default (bf16 GEMM inputs, f32 accumulation) path.
    out = patch_embed_forward(x, weight, bias, patch_size=P,
                              embed_dim=embed_dim, ratio=ratio)
    out = jax.block_until_ready(out)
    assert out.shape == (B, (H // P) * (W // P), edc)
    assert jnp.allclose(out, ref, atol=1e-2, rtol=1e-2)

    # Full-f32 path (same kernel, compute_dtype=f32) for a tight check.
    out_f32 = patch_embed_forward(x, weight, bias, patch_size=P,
                                  embed_dim=embed_dim, ratio=ratio,
                                  compute_dtype=jnp.float32)
    out_f32 = jax.block_until_ready(out_f32)
    assert jnp.allclose(out_f32, ref, atol=1e-5, rtol=1e-5)

    # "First channels" slicing branch (ratio == largest_ratio), f32 path.
    ref_full = reference(1.0)
    out_full = patch_embed_forward(x, weight, bias, patch_size=P,
                                   embed_dim=embed_dim, ratio=1.0,
                                   compute_dtype=jnp.float32)
    out_full = jax.block_until_ready(out_full)
    assert out_full.shape == (B, (H // P) * (W // P), embed_dim)
    assert jnp.allclose(out_full, ref_full, atol=1e-5, rtol=1e-5)

    print("KERNEL_OK")
</pallas_src>

<mosaic_0001>
module attributes {stable_mosaic.version = 11 : i64} {
  func.func @_patch_embed_kernel(%arg0: i32, %arg1: i32, %arg2: memref<16x128xbf16, #tpu.memory_space<vmem>>, %arg3: memref<128x128xbf16, #tpu.memory_space<vmem>>, %arg4: memref<1x128xf32, #tpu.memory_space<vmem>>, %arg5: memref<16x128xf32, #tpu.memory_space<vmem>>) attributes {dimension_semantics = [#tpu.dimension_semantics<parallel>, #tpu.dimension_semantics<parallel>], iteration_bounds = array<i64: 1, 2>, scalar_prefetch = 0 : i64, scratch_operands = 0 : i64, tpu.core_type = #tpu.core_type<tc>, window_params = [{transform_indices = @transform_0, window_bounds = array<i64: 16, 128>}, {transform_indices = @transform_1, window_bounds = array<i64: 128, 128>}, {transform_indices = @transform_2, window_bounds = array<i64: 1, 128>}, {transform_indices = @transform_3, window_bounds = array<i64: 16, 128>}]} {
    %c0 = arith.constant 0 : index
    %c0_0 = arith.constant 0 : index
    %0 = vector.load %arg2[%c0, %c0_0] : memref<16x128xbf16, #tpu.memory_space<vmem>>, vector<16x128xbf16>
    %c0_1 = arith.constant 0 : index
    %c0_2 = arith.constant 0 : index
    %1 = vector.load %arg3[%c0_1, %c0_2] : memref<128x128xbf16, #tpu.memory_space<vmem>>, vector<128x128xbf16>
    %cst = arith.constant dense<0.000000e+00> : vector<16x128xf32>
    %2 = tpu.matmul %0, %1, %cst {dimension_numbers = #tpu.dot_dimension_numbers<[1], [0], [0], [1], [0, 0, 1, 1], [], []>} : vector<16x128xbf16>, vector<128x128xbf16>, vector<16x128xf32> -> vector<16x128xf32>
    %c0_3 = arith.constant 0 : index
    %c0_4 = arith.constant 0 : index
    %3 = vector.load %arg4[%c0_3, %c0_4] : memref<1x128xf32, #tpu.memory_space<vmem>>, vector<1x128xf32>
    %4 = vector.broadcast %3 : vector<1x128xf32> to vector<16x128xf32>
    %5 = arith.addf %2, %4 : vector<16x128xf32>
    %c0_5 = arith.constant 0 : index
    %c0_6 = arith.constant 0 : index
    %6 = vector.load %arg5[%c0_5, %c0_6] : memref<16x128xf32, #tpu.memory_space<vmem>>, vector<16x128xf32>
    tpu.vector_store %arg5[%c0_5, %c0_6], %5 {strides = array<i32>} : memref<16x128xf32, #tpu.memory_space<vmem>>, vector<16x128xf32>,
    return
  }
  func.func @transform_0(%arg0: i32, %arg1: i32) -> (i32, i32) {
    %c0_i32 = arith.constant 0 : i32
    %c0_i32_0 = arith.constant 0 : i32
    return %arg1, %c0_i32 : i32, i32
  }
  func.func @transform_1(%arg0: i32, %arg1: i32) -> (i32, i32) {
    %c0_i32 = arith.constant 0 : i32
    %c0_i32_0 = arith.constant 0 : i32
    return %c0_i32, %arg0 : i32, i32
  }
  func.func @transform_2(%arg0: i32, %arg1: i32) -> (i32, i32) {
    %c0_i32 = arith.constant 0 : i32
    %c0_i32_0 = arith.constant 0 : i32
    return %c0_i32, %arg0 : i32, i32
  }
  func.func @transform_3(%arg0: i32, %arg1: i32) -> (i32, i32) {
    %c0_i32 = arith.constant 0 : i32
    return %arg1, %arg0 : i32, i32
  }
}

</mosaic_0001>

<bundles_post_ra>
// kernel: tpu_custom_call.1
= control target key start
LH: loop header
LB: loop body
LE: loop exit
PB: predicated region body
PF: predicated region fallthrough
CT: control target
= control target key end

     0   :  { %s936_s0 = inlined_call_operand.hbm [shape: bf16[32,128], index: 0, kind: input, shape index: {}]   ;;  %s937_s1 = inlined_call_operand.hbm [shape: bf16[128,128], index: 1, kind: input, shape index: {}]   ;;  %s938_s2 = inlined_call_operand.vmem [shape: f32[1,128], index: 2, kind: input, shape index: {}]   ;;  %s939_s3 = inlined_call_operand.hbm [shape: f32[32,128], index: 3, kind: output, shape index: {}]  }
   0x1   :  { %941 = sst [smem:[#allocation11_spill]] %s937_s1 }
   0x2   :  { %8 = vsyncpa [#allocation3], 0 }
   0x3   :  { %10 = vsyncpa [#allocation3 + $0x1], 0 }
   0x4   :  { %11 = vsyncpa [#allocation6], 0 }
   0x5   :  { %12 = vsyncpa [#allocation4], 0 }
   0x6   :  { %14 = vsyncpa [#allocation4 + $0x1], 0  ;;  %s777_s12 = smov 0   ;;  %s779_s13 = smov 0  }
   0x7   :  { %s781_s14 = smov 0   ;;  %s783_s15 = smov 0  }
   0x8   :  { %s785_s16 = smov 0   ;;  %s787_s17 = smov 0  }
   0x9 LB: > { %s461_s18 = sadd.s32 4294967295, %s750_s17   ;;  %s462_s19 = sadd.s32 4294967294, %s750_s17   ;;  %s750_s17 = sphi %s787_s17, %s20_s17   ;;  %s746_s16 = sphi %s785_s16, %s955_s16   ;;  %s742_s15 = sphi %s783_s15, %s954_s15   ;;  %s738_s14 = sphi %s781_s14, %s953_s14   ;;  %s734_s13 = sphi %s779_s13, %s952_s13   ;;  %s730_s12 = sphi %s777_s12, %s951_s12  }
   0xa   : > { %p52_p0 = scmp.ne.s32.totalorder %s734_s13, %s730_s12  ;;  %p811_p1 = scmp.eq.s32.totalorder %s461_s18, 0 }
   0xb   : > { %p815_p2 = scmp.eq.s32.totalorder %s461_s18, 1  ;;  %p136_p3 = scmp.eq.s32.totalorder %s462_s19, 1 }
   0xc   : > { %p821_p4 = por %p811_p1, %p52_p0  ;;  %p463_p5 = scmp.ge.s32.totalorder %s750_s17, 1 }
   0xd   : > { %p826_p6 = por %p136_p3, %p52_p0  ;;  %p143_p7 = scmp.lt.s32.totalorder %s750_s17, 3 }
   0xe   : > { %s946_s1 = sld [smem:[#allocation11_spill]]  ;;  %s752_s28 = smov [#allocation5]  }
   0xf   : > { %p834_p8 = pnand %p463_p5, %p143_p7  ;;  %s158_s29 = sshll.u32 %s752_s28, 4  ;;  %s159_s29 = int_to_ptr.vmem [resolvable:$true] %s158_s29 }
  0x10   : > { %p466_p11 = scmp.ge.s32.totalorder %s750_s17, 2  ;;  %s940_s30 = smov 64  }
  0x11   : > { %p534_p9 = pneg %p834_p8  ;;  %s754_s4 = smov 4  }
  0x12   : > { %s29_s5 = sadd.s32 1, %s746_s16  ;;  %s39_s6 = sadd.s32 1, %s738_s14 }
  0x13   : > { %p535_p10 = pnand %p534_p9, %p811_p1  ;;  %p30_p12 = scmp.ge.s32.totalorder %s29_s5, 2 }
  0x14   : > { %s156_s26 = sshll.u32 %s946_s1, 4  ;;  %p46_p13 = scmp.ne.s32.totalorder %s738_s14, %s734_s13  ;;  %s157_s26 = int_to_ptr.hbm [resolvable:$true] %s156_s26 }
  0x15   : > { %537 = dma.hbm_to_vmem [thread:$0]  (!%p535_p10), %s157_s26, 1024, %s159_s29, [#allocation6], %s940_s30, %s940_s30, %s754_s4  }
  0x16   : > { %p47_p0 = scmp.eq.s32.totalorder %s750_s17, 0  ;;  %s957_s5 = smov (%p30_p12, %s29_s5), 0 }
  0x17   : > { %p859_p5 = por %p815_p2, %p46_p13  ;;  %s36_s9 = ssub.s32 %s746_s16, %s957_s5 }
  0x18   : > { %p853_p3 = por %p47_p0, %p46_p13  ;;  %p547_p7 = scmp.lt.s32.totalorder %s750_s17, 2 }
  0x19   : > { %p37_p9 = scmp.eq.s32.totalorder %s36_s9, 0  ;;  %s178_s10 = sand.u32 1, %s738_s14  }
  0x1a   : > { %s467_s11 = sshll.u32 %s178_s10, 3  ;;  %s515_s19 = sshll.u32 %s746_s16, 3 }
  0x1b   : > { %s868_s18 = scalar_select %p37_p9, %s738_s14, %s39_s6  }
  0x1c   : > { %s187_s26 = scalar_lea.hbm %s936_s0, %s515_s19  ;;  %s182_s28 = scalar_lea.vmem [#allocation2], %s467_s11 }
  0x1d   : > { %s190_s29 = sshll.u32 %s182_s28, 4  ;;  %s188_s21 = sshll.u32 %s187_s26, 4  ;;  %s191_s29 = int_to_ptr.vmem [resolvable:$true] %s190_s29  ;;  %s189_s21 = int_to_ptr.hbm [resolvable:$true] %s188_s21 }
  0x1e   : > { %p539_p2 = pnand %p547_p7, %p853_p3  ;;  %s179_s30 = scalar_lea.sflag [#allocation3], %s178_s10 }
  0x1f   : > { %s950_s1 = smov 64   ;;  %202 = sbr.rel (%p834_p8) target bundleno = 211 (0xd3), region = 32 }
  0x20   : > { %541 = dma.hbm_to_vmem [thread:$0]  (!%p539_p2), %s189_s21, 128, %s191_s29, %s179_s30, %s950_s1, %s950_s1, %s754_s4  }
  0x21   : > { %s882_s6 = sand.u32 (!%p834_p8), 1, %s734_s13  }
  0x22   : > { %s471_s9 = sshll.u32 (!%p834_p8), %s882_s6, 3  ;;  %s205_s11 = scalar_lea.sflag (!%p834_p8), [#allocation3], %s882_s6 }
  0x23   : > { %s208_s19 = scalar_lea.vmem (!%p834_p8), [#allocation2], %s471_s9 }
  0x24   : > { %717 = dma.done.wait (%p821_p4), %s205_s11, 128  }
  0x25   : > { %719 = vsyncadd (%p821_p4), %s205_s11, 4294967168 }
  0x26   : > { %721 = dma.done.wait (%p811_p1), [#allocation6], 1024  }
  0x27   : > { %723 = vsyncadd (%p811_p1), [#allocation6], 4294966272  ;;  %v524_v0 = vld [vmem:[#allocation5 + $0x38] sm:$0xff]  ;;  %v523_v1 = vld [vmem:[#allocation5 + $0x30] sm:$0xff]  ;;  %s473_s1 = sshll.u32 %s882_s6, 4  ;;  %s525_s27 = sshll.u32 %s742_s15, 4 }
  0x28   : > { %321 = vmatpush.bf16.msra.mxu0 %v524_v0  ;;  %v522_v2 = vld [vmem:[#allocation5 + $0x28] sm:$0xff]  ;;  %v521_v3 = vld [vmem:[#allocation5 + $0x20] sm:$0xff]  ;;  %v520_v4 = vld [vmem:[#allocation5 + $0x18] sm:$0xff]  ;;  %s350_s7 = scalar_lea.hbm %s939_s3, %s525_s27  ;;  %s239_s10 = scalar_lea.vmem [#allocation7], %s473_s1 }
  0x29   : > { %v519_v5 = vld [vmem:[#allocation5 + $0x10] sm:$0xff]  ;;  %v518_v6 = vld [vmem:[#allocation5 + $0x8] sm:$0xff]  ;;  %v517_v7 = vld [vmem:[#allocation5] sm:$0xff]  ;;  %s351_s24 = sshll.u32 %s239_s10, 4  ;;  %s353_s25 = sshll.u32 %s350_s7, 4  ;;  %s352_s24 = int_to_ptr.vmem [resolvable:$true] %s351_s24  ;;  %s354_s25 = int_to_ptr.hbm [resolvable:$true] %s353_s25 }
  0x2a   : > { %v516_v8 = vld [vmem:[%s208_s19] sm:$0xff]  ;;  %s338_s26 = scalar_lea.sflag [#allocation4], %s882_s6  ;;  %s678_s28 = sshra.s32 %s354_s25, 4  ;;  %s679_s28 = int_to_ptr.hbm [resolvable:$true] %s678_s28 }
  0x2b   : > { %v603_v9 = vld [vmem:[%s938_s2] ss:$0 sm:$0xff]  ;;  %s680_s15 = scalar_lea.hbm %s679_s28, 16  ;;  %s684_s9 = scalar_lea.hbm %s939_s3, 32 }
  0x2c   : > { %322 = vmatpush.bf16.msra.mxu0 %v523_v1  ;;  %p681_p1 = scmp.ne.s32.totalorder %s679_s28, %s680_s15  ;;  %p685_p10 = scmp.lt.s32.totalorder %s679_s28, %s939_s3 }
  0x2d   : > { %p686_p12 = scmp.lt.s32.totalorder %s684_s9, %s680_s15 }
  0x2e   : > { %p682_p4 = pnand %p681_p1, %p859_p5 }
  0x2f   : > { %p687_p13 = por %p686_p12, %p685_p10 }
  0x30   : > { %323 = vmatpush.bf16.msra.mxu0 %v522_v2  ;;  %p683_p8 = pneg %p682_p4 }
  0x32   : > { %p688_p0 = pnand %p687_p13, %p683_p8 }
  0x34   : > { %324 = vmatpush.bf16.msra.mxu0 %v521_v3 }
  0x38   : > { %325 = vmatpush.bf16.msra.mxu0 %v520_v4 }
  0x3c   : > { %326 = vmatpush.bf16.msra.mxu0 %v519_v5 }
  0x40   : > { %327 = vmatpush.bf16.msra.mxu0 %v518_v6 }
  0x44   : > { %328 = vmatpush.bf16.msra.mxu0 %v517_v7 }
  0x47   : > { %329 = vmatmul.bf16.vlgmr.msra.gmra.mxu0 %v516_v8 }
  0xc4   : > { %v330_v10 = vpop.f32.mrf.mxu0 }
  0xc5   : > { %v331_v11 = vadd.f32 %v603_v9, %v330_v10 }
  0xc7   : > { %335 = vst [vmem:[%s239_s10] sm:$0xff] %v331_v11 }
  0xcc   : > { %v332_v12 = vpop.f32.mrf.mxu0 }
  0xcd   : > { %v333_v13 = vadd.f32 %v603_v9, %v332_v12 }
  0xcf   : > { %336 = vst [vmem:[%s239_s10 + $0x8] sm:$0xff] %v333_v13 }
  0xd0   : > { %691 = shalt.err (!%p688_p0)
}
  0xd1   : > { %s755_s6 = smov 128   ;;  %s756_s1 = smov 8  }
  0xd2   : > { %532 = dma.vmem_to_hbm [thread:$0]  (%p859_p5), %s352_s24, 256, %s354_s25, %s338_s26, %s755_s6, %s755_s6, %s756_s1  }
  0xd3 PF: > { %s368_s20 = sand.u32 1, %s730_s12   ;;  %p543_p3 = pnand %p466_p11, %p826_p6 }
  0xd4   : > { %s369_s22 = scalar_lea.sflag [#allocation4], %s368_s20 }
  0xd5   : > { %p544_p7 = pneg %p543_p3 }
  0xd7   : > { %725 = dma.done.wait (%p544_p7), %s369_s22, 256  }
  0xd8   : > { %727 = vsyncadd (%p544_p7), %s369_s22, 4294967040  ;;  %s20_s17 = sadd.s32 1, %s750_s17   ;;  %s951_s12 = smov %s734_s13 }
  0xd9   : > { %p17_p9 = scmp.ge.s32.totalorder %s20_s17, 4   ;;  %s952_s13 = smov %s738_s14 }
  0xda   : > { %s953_s14 = smov %s868_s18  ;;  %s954_s15 = smov %s746_s16 }
  0xdb   : > { %s955_s16 = smov %s957_s5  ;;  %19 = sbr.rel (!%p17_p9) target bundleno = 9 (0x9), region = 85 }
  0xe0   :  { %375 = vsyncpa [#allocation3], 1 }
  0xe1   :  { %377 = vsyncpa [#allocation3 + $0x1], 1 }
  0xe2   :  { %378 = vsyncpa [#allocation6], 1 }
  0xe3   :  { %379 = vsyncpa [#allocation4], 1 }
  0xe4   :  { %381 = vsyncpa [#allocation4 + $0x1], 1 }

</bundles_post_ra>
